<compile_context>
chip_gen: v7x
topology: tpu7x:2x2x1
jax: 0.10.0
libtpu: 0.0.40
codegen_flags: <defaults>
</compile_context>

<pallas_src>
import functools

import jax
import jax.numpy as jnp
import numpy as np
from jax.experimental import pallas as pl
from jax.experimental.pallas import tpu as pltpu


def _round_up(x, m):
    return ((x + m - 1) // m) * m


def _vmem_limit_bytes():
    """~75% of physical VMEM; safe on v7x (64 MiB), roomy on v5e/v6e (128 MiB)."""
    try:
        cap = pltpu.get_tpu_info().vmem_capacity_bytes
    except Exception:
        cap = 64 * 1024 * 1024  # conservative fallback (v7x-sized)
    return int(cap * 0.75)


# --------------------------------------------------------------------------
# Pallas kernel 1: matmul + bias with fused per-tile BN statistics
#   y   = x @ w + b                       (bf16 out, f32 accumulate)
#   ps  = per-tile column sums of y       (f32)
#   pq  = per-tile column sums of y*y     (f32)
# --------------------------------------------------------------------------
def _mm_bias_stats_nk1_kernel(x_ref, w_ref, b_ref, o_ref, sum_ref, sq_ref):
    # Single-K-block fast path: no accumulator scratch, no pl.when branches.
    acc = b_ref[...] + jnp.dot(x_ref[...], w_ref[...],
                               preferred_element_type=jnp.float32)
    o_ref[...] = acc.astype(o_ref.dtype)
    s = jnp.sum(acc, axis=0, keepdims=True)            # (1, tn)
    q = jnp.sum(acc * acc, axis=0, keepdims=True)      # (1, tn)
    sum_ref[...] = jnp.broadcast_to(s, sum_ref.shape)  # (8, tn) lane-dense store
    sq_ref[...] = jnp.broadcast_to(q, sq_ref.shape)


def _mm_bias_stats_kernel(x_ref, w_ref, b_ref, o_ref, sum_ref, sq_ref,
                          acc_ref, *, nk):
    k = pl.program_id(2)

    @pl.when(k == 0)
    def _():
        # Fold the bias add into the accumulator init.
        acc_ref[...] = jnp.broadcast_to(b_ref[...], acc_ref.shape)

    acc_ref[...] += jnp.dot(x_ref[...], w_ref[...],
                            preferred_element_type=jnp.float32)

    @pl.when(k == nk - 1)
    def _():
        acc = acc_ref[...]
        o_ref[...] = acc.astype(o_ref.dtype)
        sum_ref[...] = jnp.broadcast_to(
            jnp.sum(acc, axis=0, keepdims=True), sum_ref.shape)
        sq_ref[...] = jnp.broadcast_to(
            jnp.sum(acc * acc, axis=0, keepdims=True), sq_ref.shape)


def matmul_bias_stats(x, w, b, *, tm_max=1024, tn_max=512, tk_max=1024):
    """y = x @ w + b plus per-channel-column sum / sum-of-squares of y.

    x: (M, K) bf16, w: (K, Ncol) bf16, b: (Ncol,) f32, Ncol % 128 == 0.
    Returns (y_bf16 (m_pad, Ncol), col_sum (Ncol,), col_sq (Ncol,), tm).
    Padded rows' bias contribution is already removed from the statistics.
    """
    M, K = x.shape
    Ncol = w.shape[1]
    assert Ncol % 128 == 0, "caller pads the fused tap*channel axis to 128"

    # --- M tiling: keep >=2 tiles so v7x's two TensorCores both get work.
    tm = min(tm_max, _round_up(M, 8))
    if _round_up(M, tm) // tm < 2 and M > 8:
        tm = _round_up(pl.cdiv(M, 2), 8)
    m_pad = _round_up(M, tm)
    n_pad_rows = m_pad - M
    nm = m_pad // tm

    # --- N tiling: largest 128-multiple divisor of Ncol that is <= tn_max.
    if Ncol <= tn_max:
        tn = Ncol
    else:
        tn = max(c for c in range(128, tn_max + 1, 128) if Ncol % c == 0)
    nj = Ncol // tn

    # --- K tiling: full-K block when it fits (avoids a pad copy).
    if K <= tk_max:
        tk, k_pad = K, K
    else:
        tk = tk_max
        k_pad = _round_up(K, tk)
    nk = k_pad // tk

    if (m_pad, k_pad) != (M, K):
        x = jnp.pad(x, ((0, m_pad - M), (0, k_pad - K)))
    if k_pad != K:
        w = jnp.pad(w, ((0, k_pad - K), (0, 0)))
    b2 = b.reshape(1, Ncol)

    if nk == 1:
        kernel = _mm_bias_stats_nk1_kernel
        scratch = []
    else:
        kernel = functools.partial(_mm_bias_stats_kernel, nk=nk)
        scratch = [pltpu.VMEM((tm, tn), jnp.float32)]

    y, ps, pq = pl.pallas_call(
        kernel,
        out_shape=(
            jax.ShapeDtypeStruct((m_pad, Ncol), jnp.bfloat16),
            jax.ShapeDtypeStruct((nm * 8, Ncol), jnp.float32),   # per-tile partials
            jax.ShapeDtypeStruct((nm * 8, Ncol), jnp.float32),
        ),
        grid_spec=pltpu.PrefetchScalarGridSpec(
            num_scalar_prefetch=0,
            grid=(nm, nj, nk),
            in_specs=[
                pl.BlockSpec((tm, tk), lambda i, j, k: (i, k)),
                pl.BlockSpec((tk, tn), lambda i, j, k: (k, j)),
                pl.BlockSpec((1, tn), lambda i, j, k: (0, j)),
            ],
            out_specs=(
                pl.BlockSpec((tm, tn), lambda i, j, k: (i, j)),
                pl.BlockSpec((8, tn), lambda i, j, k: (i, j)),
                pl.BlockSpec((8, tn), lambda i, j, k: (i, j)),
            ),
            scratch_shapes=scratch,
        ),
        compiler_params=pltpu.CompilerParams(
            dimension_semantics=("parallel", "parallel", "arbitrary"),
            vmem_limit_bytes=_vmem_limit_bytes(),
        ),
    )(x, w, b2)

    # Finish the (nm, Ncol) -> (Ncol,) reduction in JAX (tiny), and remove the
    # bias contribution of the zero-padded rows (their post-bias value is b).
    ps = ps.reshape(nm, 8, Ncol)[:, 0, :].sum(axis=0)
    pq = pq.reshape(nm, 8, Ncol)[:, 0, :].sum(axis=0)
    if n_pad_rows:
        ps = ps - float(n_pad_rows) * b
        pq = pq - float(n_pad_rows) * b * b
    return y, ps, pq, tm


# --------------------------------------------------------------------------
# Pallas kernel 2: scale/shift + ReLU (BN normalize), in the matmul layout
# --------------------------------------------------------------------------
def _scale_shift_relu_kernel(x_ref, s_ref, t_ref, o_ref):
    o_ref[...] = jnp.maximum(
        x_ref[...].astype(jnp.float32) * s_ref[...] + t_ref[...], 0.0)


def scale_shift_relu(y, scale_cols, shift_cols, tb):
    """y: (Mp, Ncol) bf16; scale/shift: (1, Ncol) f32; tb must divide Mp."""
    Mp, Ncol = y.shape
    # Keep the block working set modest (v7x 64 MiB VMEM); halving preserves
    # divisibility of Mp and the multiple-of-8 constraint.
    while tb * Ncol * 6 > (12 << 20) and tb % 16 == 0:
        tb //= 2
    return pl.pallas_call(
        _scale_shift_relu_kernel,
        out_shape=jax.ShapeDtypeStruct((Mp, Ncol), jnp.float32),
        grid_spec=pltpu.PrefetchScalarGridSpec(
            num_scalar_prefetch=0,
            grid=(Mp // tb,),
            in_specs=[
                pl.BlockSpec((tb, Ncol), lambda i: (i, 0)),
                pl.BlockSpec((1, Ncol), lambda i: (0, 0)),
                pl.BlockSpec((1, Ncol), lambda i: (0, 0)),
            ],
            out_specs=pl.BlockSpec((tb, Ncol), lambda i: (i, 0)),
        ),
        compiler_params=pltpu.CompilerParams(
            dimension_semantics=("parallel",),
            vmem_limit_bytes=_vmem_limit_bytes(),
        ),
    )(y, scale_cols, shift_cols)


# --------------------------------------------------------------------------
# Upsample forward (NCHW in, NCHW out — matches the PyTorch module)
# --------------------------------------------------------------------------
def upsample_forward(x_nchw, x2_nchw, params, *, eps=1e-5):
    N, Cin, H, W = x_nchw.shape
    Cout = params["wt"].shape[-1]
    M = N * H * W
    Nu = 4 * Cout                      # used columns: (ky, kx, co), tap-major
    Ncol = _round_up(Nu, 128)          # lane-dense padding of the FUSED axis

    # bf16 once in the wrapper (f32 accumulation inside the kernel).
    x_rows = jnp.transpose(x_nchw, (0, 2, 3, 1)).reshape(M, Cin).astype(jnp.bfloat16)
    w2d = jnp.pad(params["wt"].reshape(Cin, Nu),
                  ((0, 0), (0, Ncol - Nu))).astype(jnp.bfloat16)
    b_cols = jnp.pad(jnp.tile(params["bt"], 4), (0, Ncol - Nu))          # f32

    # ConvTranspose2d(Cin, Cout, 2, 2): out[n, 2h+ky, 2w+kx, co]
    #   = sum_ci x[n,h,w,ci] * wt[ci,ky,kx,co] + b[co]
    y, col_sum, col_sq, tm = matmul_bias_stats(x_rows, w2d, b_cols)

    # BatchNorm2d training-mode batch statistics (per output channel, over
    # N * 2H * 2W = 4*M elements), finished from the fused partial sums.
    cnt = 4.0 * M
    ch_sum = col_sum[:Nu].reshape(4, Cout).sum(axis=0)
    ch_sq = col_sq[:Nu].reshape(4, Cout).sum(axis=0)
    mean = ch_sum / cnt
    var = jnp.maximum(ch_sq / cnt - mean * mean, 0.0)    # biased var (PyTorch norm)
    scale = params["gamma"] * jax.lax.rsqrt(var + eps)
    shift = params["beta"] - mean * scale
    scale_cols = jnp.pad(jnp.tile(scale, 4), (0, Ncol - Nu)).reshape(1, Ncol)
    shift_cols = jnp.pad(jnp.tile(shift, 4), (0, Ncol - Nu)).reshape(1, Ncol)

    # Normalize + ReLU in the matmul layout (scale/shift tiled over taps),
    # then let XLA fuse slice + tap-untangle + pad + NCHW transpose.
    y = scale_shift_relu(y, scale_cols, shift_cols, tm)   # (m_pad, Ncol) f32
    y = y[:M, :Nu].reshape(N, H, W, 2, 2, Cout)
    y = y.transpose(0, 1, 3, 2, 4, 5).reshape(N, 2 * H, 2 * W, Cout)

    # F.pad(x1, [dX//2, dX-dX//2, dY//2, dY-dY//2]) to match x2's spatial size.
    dY = x2_nchw.shape[2] - 2 * H
    dX = x2_nchw.shape[3] - 2 * W
    y = jnp.pad(y, ((0, 0), (dY // 2, dY - dY // 2), (dX // 2, dX - dX // 2), (0, 0)))
    return jnp.transpose(y, (0, 3, 1, 2))                 # -> NCHW


# --------------------------------------------------------------------------
# Parameter init (deterministic, PyTorch-default-like uniform(+-1/sqrt(fan_in)))
# --------------------------------------------------------------------------
def init_upsample_params(key, in_c):
    out_c = in_c // 2
    k1, k2 = jax.random.split(key)
    bound = 1.0 / np.sqrt(in_c * 2 * 2)
    wt = jax.random.uniform(k1, (in_c, 2, 2, out_c), jnp.float32, -bound, bound)
    bt = jax.random.uniform(k2, (out_c,), jnp.float32, -bound, bound)
    return {
        "wt": wt,
        "bt": bt,
        "gamma": jnp.ones((out_c,), jnp.float32),
        "beta": jnp.zeros((out_c,), jnp.float32),
    }


# --------------------------------------------------------------------------
# Pure-JAX reference (same bf16-MXU / bf16-intermediate / f32-stats contract)
# NOTE: bf16 MXU inputs + bf16 intermediate differ from PyTorch's f32
#       ConvTranspose2d; this is the intended TPU contract (f32 accumulate).
# --------------------------------------------------------------------------
def upsample_reference(x_nchw, x2_nchw, params, *, eps=1e-5):
    N, Cin, H, W = x_nchw.shape
    Cout = params["wt"].shape[-1]
    x = jnp.transpose(x_nchw, (0, 2, 3, 1))
    y = jnp.einsum(
        "nhwc,cyxo->nhywxo",
        x.astype(jnp.bfloat16),
        params["wt"].astype(jnp.bfloat16),
        preferred_element_type=jnp.float32,
    ).reshape(N, 2 * H, 2 * W, Cout) + params["bt"]
    mean = jnp.mean(y, axis=(0, 1, 2), keepdims=True)
    var = jnp.maximum(jnp.mean(y * y, axis=(0, 1, 2), keepdims=True) - mean * mean, 0.0)
    scale = params["gamma"] * jax.lax.rsqrt(var + eps)
    shift = params["beta"] - mean * scale
    y = jnp.maximum(y.astype(jnp.bfloat16).astype(jnp.float32) * scale + shift, 0.0)
    dY = x2_nchw.shape[2] - 2 * H
    dX = x2_nchw.shape[3] - 2 * W
    y = jnp.pad(y, ((0, 0), (dY // 2, dY - dY // 2), (dX // 2, dX - dX // 2), (0, 0)))
    return jnp.transpose(y, (0, 3, 1, 2))


if __name__ == "__main__":
    key = jax.random.PRNGKey(0)
    kp, kx, kx2 = jax.random.split(key, 3)

    in_c, out_c = 8, 4
    N, H, W = 2, 16, 16
    params = init_upsample_params(kp, in_c)

    x = jax.random.normal(kx, (N, in_c, H, W), dtype=jnp.float32)        # NCHW
    # skip-connection tensor is 2 pixels larger so the F.pad branch is exercised
    x2 = jax.random.normal(kx2, (N, out_c, 2 * H + 2, 2 * W + 2), jnp.float32)

    fwd = jax.jit(upsample_forward)
    y = jax.block_until_ready(fwd(x, x2, params))

    assert y.shape == (N, out_c, 2 * H + 2, 2 * W + 2), y.shape
    assert bool(jnp.all(jnp.isfinite(y)))
    assert bool(jnp.all(y >= 0.0))                       # ReLU output
    assert bool(jnp.all(y[:, :, 0, :] == 0.0))           # F.pad zero border
    assert bool(jnp.all(y[:, :, :, -1] == 0.0))

    y_ref = upsample_reference(x, x2, params)
    assert bool(jnp.allclose(y, y_ref, atol=5e-3, rtol=5e-3))

    print("KERNEL_OK")
</pallas_src>

<mosaic_0001>
module attributes {stable_mosaic.version = 11 : i64} {
  func.func @_mm_bias_stats_nk1_kernel(%arg0: i32, %arg1: i32, %arg2: i32, %arg3: memref<256x8xbf16, #tpu.memory_space<vmem>>, %arg4: memref<8x128xbf16, #tpu.memory_space<vmem>>, %arg5: memref<1x128xf32, #tpu.memory_space<vmem>>, %arg6: memref<256x128xbf16, #tpu.memory_space<vmem>>, %arg7: memref<8x128xf32, #tpu.memory_space<vmem>>, %arg8: memref<8x128xf32, #tpu.memory_space<vmem>>) attributes {dimension_semantics = [#tpu.dimension_semantics<parallel>, #tpu.dimension_semantics<parallel>, #tpu.dimension_semantics<arbitrary>], iteration_bounds = array<i64: 2, 1, 1>, scalar_prefetch = 0 : i64, scratch_operands = 0 : i64, tpu.core_type = #tpu.core_type<tc>, window_params = [{transform_indices = @transform_0, window_bounds = array<i64: 256, 8>}, {transform_indices = @transform_1, window_bounds = array<i64: 8, 128>}, {transform_indices = @transform_2, window_bounds = array<i64: 1, 128>}, {transform_indices = @transform_3, window_bounds = array<i64: 256, 128>}, {transform_indices = @transform_4, window_bounds = array<i64: 8, 128>}, {transform_indices = @transform_5, window_bounds = array<i64: 8, 128>}]} {
    %c0 = arith.constant 0 : index
    %c0_0 = arith.constant 0 : index
    %0 = vector.load %arg5[%c0, %c0_0] : memref<1x128xf32, #tpu.memory_space<vmem>>, vector<1x128xf32>
    %c0_1 = arith.constant 0 : index
    %c0_2 = arith.constant 0 : index
    %1 = vector.load %arg3[%c0_1, %c0_2] : memref<256x8xbf16, #tpu.memory_space<vmem>>, vector<256x8xbf16>
    %c0_3 = arith.constant 0 : index
    %c0_4 = arith.constant 0 : index
    %2 = vector.load %arg4[%c0_3, %c0_4] : memref<8x128xbf16, #tpu.memory_space<vmem>>, vector<8x128xbf16>
    %cst = arith.constant dense<0.000000e+00> : vector<256x128xf32>
    %3 = tpu.matmul %1, %2, %cst {dimension_numbers = #tpu.dot_dimension_numbers<[1], [0], [0], [1], [0, 0, 1, 1], [], []>} : vector<256x8xbf16>, vector<8x128xbf16>, vector<256x128xf32> -> vector<256x128xf32>
    %4 = vector.broadcast %0 : vector<1x128xf32> to vector<256x128xf32>
    %5 = arith.addf %4, %3 : vector<256x128xf32>
    %6 = arith.truncf %5 : vector<256x128xf32> to vector<256x128xbf16>
    %c0_5 = arith.constant 0 : index
    %c0_6 = arith.constant 0 : index
    %7 = vector.load %arg6[%c0_5, %c0_6] : memref<256x128xbf16, #tpu.memory_space<vmem>>, vector<256x128xbf16>
    tpu.vector_store %arg6[%c0_5, %c0_6], %6 {strides = array<i32>} : memref<256x128xbf16, #tpu.memory_space<vmem>>, vector<256x128xbf16>,
    %cst_7 = arith.constant dense<0.000000e+00> : vector<128xf32>
    %8 = vector.multi_reduction <add>, %5, %cst_7 [0] : vector<256x128xf32> to vector<128xf32>
    %9 = vector.shape_cast %8 : vector<128xf32> to vector<1x128xf32>
    %10 = arith.mulf %5, %5 : vector<256x128xf32>
    %cst_8 = arith.constant dense<0.000000e+00> : vector<128xf32>
    %11 = vector.multi_reduction <add>, %10, %cst_8 [0] : vector<256x128xf32> to vector<128xf32>
    %12 = vector.shape_cast %11 : vector<128xf32> to vector<1x128xf32>
    %13 = vector.shape_cast %9 : vector<1x128xf32> to vector<1x128xf32>
    %14 = vector.broadcast %13 : vector<1x128xf32> to vector<8x128xf32>
    %c0_9 = arith.constant 0 : index
    %c0_10 = arith.constant 0 : index
    %15 = vector.load %arg7[%c0_9, %c0_10] : memref<8x128xf32, #tpu.memory_space<vmem>>, vector<8x128xf32>
    tpu.vector_store %arg7[%c0_9, %c0_10], %14 {strides = array<i32>} : memref<8x128xf32, #tpu.memory_space<vmem>>, vector<8x128xf32>,
    %16 = vector.shape_cast %12 : vector<1x128xf32> to vector<1x128xf32>
    %17 = vector.broadcast %16 : vector<1x128xf32> to vector<8x128xf32>
    %c0_11 = arith.constant 0 : index
    %c0_12 = arith.constant 0 : index
    %18 = vector.load %arg8[%c0_11, %c0_12] : memref<8x128xf32, #tpu.memory_space<vmem>>, vector<8x128xf32>
    tpu.vector_store %arg8[%c0_11, %c0_12], %17 {strides = array<i32>} : memref<8x128xf32, #tpu.memory_space<vmem>>, vector<8x128xf32>,
    return
  }
  func.func @transform_0(%arg0: i32, %arg1: i32, %arg2: i32) -> (i32, i32) {
    %c0_i32 = arith.constant 0 : i32
    return %arg0, %arg2 : i32, i32
  }
  func.func @transform_1(%arg0: i32, %arg1: i32, %arg2: i32) -> (i32, i32) {
    %c0_i32 = arith.constant 0 : i32
    return %arg2, %arg1 : i32, i32
  }
  func.func @transform_2(%arg0: i32, %arg1: i32, %arg2: i32) -> (i32, i32) {
    %c0_i32 = arith.constant 0 : i32
    %c0_i32_0 = arith.constant 0 : i32
    return %c0_i32, %arg1 : i32, i32
  }
  func.func @transform_3(%arg0: i32, %arg1: i32, %arg2: i32) -> (i32, i32) {
    %c0_i32 = arith.constant 0 : i32
    return %arg0, %arg1 : i32, i32
  }
  func.func @transform_4(%arg0: i32, %arg1: i32, %arg2: i32) -> (i32, i32) {
    %c0_i32 = arith.constant 0 : i32
    return %arg0, %arg1 : i32, i32
  }
  func.func @transform_5(%arg0: i32, %arg1: i32, %arg2: i32) -> (i32, i32) {
    %c0_i32 = arith.constant 0 : i32
    return %arg0, %arg1 : i32, i32
  }
}

module attributes {stable_mosaic.version = 11 : i64} {
  func.func @_scale_shift_relu_kernel(%arg0: i32, %arg1: memref<256x128xbf16, #tpu.memory_space<vmem>>, %arg2: memref<1x128xf32, #tpu.memory_space<vmem>>, %arg3: memref<1x128xf32, #tpu.memory_space<vmem>>, %arg4: memref<256x128xf32, #tpu.memory_space<vmem>>) attributes {dimension_semantics = [#tpu.dimension_semantics<parallel>], iteration_bounds = array<i64: 2>, scalar_prefetch = 0 : i64, scratch_operands = 0 : i64, tpu.core_type = #tpu.core_type<tc>, window_params = [{transform_indices = @transform_0, window_bounds = array<i64: 256, 128>}, {pipeline_mode = #tpu.pipeline_mode<synchronous>, transform_indices = @transform_1, window_bounds = array<i64: 1, 128>}, {pipeline_mode = #tpu.pipeline_mode<synchronous>, transform_indices = @transform_2, window_bounds = array<i64: 1, 128>}, {transform_indices = @transform_3, window_bounds = array<i64: 256, 128>}]} {
    %c0 = arith.constant 0 : index
    %c0_0 = arith.constant 0 : index
    %0 = vector.load %arg1[%c0, %c0_0] : memref<256x128xbf16, #tpu.memory_space<vmem>>, vector<256x128xbf16>
    %1 = arith.extf %0 : vector<256x128xbf16> to vector<256x128xf32>
    %c0_1 = arith.constant 0 : index
    %c0_2 = arith.constant 0 : index
    %2 = vector.load %arg2[%c0_1, %c0_2] : memref<1x128xf32, #tpu.memory_space<vmem>>, vector<1x128xf32>
    %3 = vector.broadcast %2 : vector<1x128xf32> to vector<256x128xf32>
    %4 = arith.mulf %1, %3 : vector<256x128xf32>
    %c0_3 = arith.constant 0 : index
    %c0_4 = arith.constant 0 : index
    %5 = vector.load %arg3[%c0_3, %c0_4] : memref<1x128xf32, #tpu.memory_space<vmem>>, vector<1x128xf32>
    %6 = vector.broadcast %5 : vector<1x128xf32> to vector<256x128xf32>
    %7 = arith.addf %4, %6 : vector<256x128xf32>
    %cst = arith.constant 0.000000e+00 : f32
    %8 = vector.broadcast %cst : f32 to vector<256x128xf32>
    %9 = arith.maximumf %7, %8 : vector<256x128xf32>
    %c0_5 = arith.constant 0 : index
    %c0_6 = arith.constant 0 : index
    %10 = vector.load %arg4[%c0_5, %c0_6] : memref<256x128xf32, #tpu.memory_space<vmem>>, vector<256x128xf32>
    tpu.vector_store %arg4[%c0_5, %c0_6], %9 {strides = array<i32>} : memref<256x128xf32, #tpu.memory_space<vmem>>, vector<256x128xf32>,
    return
  }
  func.func @transform_0(%arg0: i32) -> (i32, i32) {
    %c0_i32 = arith.constant 0 : i32
    %c0_i32_0 = arith.constant 0 : i32
    return %arg0, %c0_i32 : i32, i32
  }
  func.func @transform_1(%arg0: i32) -> (i32, i32) {
    %c0_i32 = arith.constant 0 : i32
    %c0_i32_0 = arith.constant 0 : i32
    %c0_i32_1 = arith.constant 0 : i32
    return %c0_i32, %c0_i32_0 : i32, i32
  }
  func.func @transform_2(%arg0: i32) -> (i32, i32) {
    %c0_i32 = arith.constant 0 : i32
    %c0_i32_0 = arith.constant 0 : i32
    %c0_i32_1 = arith.constant 0 : i32
    return %c0_i32, %c0_i32_0 : i32, i32
  }
  func.func @transform_3(%arg0: i32) -> (i32, i32) {
    %c0_i32 = arith.constant 0 : i32
    %c0_i32_0 = arith.constant 0 : i32
    return %arg0, %c0_i32 : i32, i32
  }
}

</mosaic_0001>

<bundles_post_ra>
// kernel: tile.18
= control target key start
LH: loop header
LB: loop body
LE: loop exit
PB: predicated region body
PF: predicated region fallthrough
CT: control target
= control target key end

     0   :  { %2 = vsyncpa [#allocation1], 0  ;;  %s44_s6 = smov [#allocation0]   ;;  %s70_s0 = inlined_call_operand.hbm [shape: f32[4], index: 0, kind: input, shape index: {}]   ;;  %s71_s1 = inlined_call_operand.vmem [shape: f32[4,4], index: 1, kind: output, shape index: {}]  }
   0x1   :  { %s9_s7 = sshll.u32 %s44_s6, 4  ;;  %s20_s10 = scalar_lea.hbm %s70_s0, 16  ;;  %s10_s7 = int_to_ptr.vmem [resolvable:$true] %s9_s7 }
   0x2   :  { %p21_p0 = scmp.ne.s32.totalorder %s70_s0, %s20_s10  ;;  %p24_p1 = scmp.lt.u32.totalorder %s20_s10, %s70_s0 }
   0x4   :  { %p26_p2 = pnand %p24_p1, %p21_p0 }
   0x6   :  { %29 = shalt.err (!%p26_p2)
}
   0x7   :  { %s30_s15 = scalar_lea.vmem %s10_s7, 16  ;;  %s34_s16 = scalar_lea.vmem %s10_s7, 32 }
   0x8   :  { %p31_p3 = scmp.ne.s32.totalorder %s10_s7, %s30_s15  ;;  %p35_p4 = scmp.lt.s32.totalorder %s10_s7, %s10_s7 }
   0x9   :  { %p36_p5 = scmp.lt.s32.totalorder %s34_s16, %s30_s15 }
   0xb   :  { %p37_p6 = por %p36_p5, %p35_p4 }
   0xd   :  { %p38_p7 = pnand %p37_p6, %p31_p3 }
   0xf   :  { %41 = shalt.err (!%p38_p7)
}
  0x10   :  { %12 = dma.hbm_to_vmem [thread:$0]  %s70_s0, 16, %s10_s7, [#allocation1]  }
  0x11   :  { %42 = dma.done.wait [#allocation1], 16  }
  0x12   :  { %43 = vsyncadd [#allocation1], 4294967280  ;;  %v16_v0 = vld [vmem:[#allocation0] ss:$0 sm:$0xff] }
  0x13   :  { %17 = vst [vmem:[%s71_s1] sm:$0xf] %v16_v0 }
  0x14   :  { %18 = vsyncpa [#allocation1], 1 }

// kernel: tile.19
= control target key start
LH: loop header
LB: loop body
LE: loop exit
PB: predicated region body
PF: predicated region fallthrough
CT: control target
= control target key end

     0   :  { %vm7_vm0 = vcmask 31744   ;;  %s37_s8 = smov 4   ;;  %s38_s9 = smov 8   ;;  %vm13_vm1 = vcmask 130144   ;;  %vm19_vm2 = vcmask 97344   ;;  %vm25_vm3 = vcmask 64544   ;;  %s55_s0 = inlined_call_operand.vmem [shape: f32[4,4], index: 0, kind: input, shape index: {}]   ;;  %s56_s1 = inlined_call_operand.vmem [shape: f32[16], index: 1, kind: output, shape index: {}]  }
   0x1   :  { %v4_v0 = vld [vmem:[%s55_s0] sm:$0xf]  ;;  %s36_s0 = smov 12  }
   0x2   :  { %5 = vst [vmem:[#allocation1] sm:$0xf] %v4_v0 }
   0x9   :  { %v10_v1 = vld [vmem:[#allocation1 + $0x3] sm:$0x1]   ;;  %v22_v2 = vld [vmem:[#allocation1 + $0x1] sm:$0x1]   ;;  %v6_v3 = vld [vmem:[#allocation1] sm:$0x1]  }
   0xa   :  { %11 = vrot.lane.b32.xlu0 %v10_v1, %s36_s0  ;;  %23 = vrot.lane.b32.xlu1 %v22_v2, %s37_s8  ;;  %v16_v4 = vld [vmem:[#allocation1 + $0x2] sm:$0x1]   ;;  %8 = vst.msk [vmem:[#allocation0] sm:$0x1] %vm7_vm0, %v6_v3  }
   0xe   :  { %17 = vrot.lane.b32.xlu0 %v16_v4, %s38_s9 }
  0x7c   :  { %v12_v5 = vpop.permute.xlu0 %11   ;;  %v24_v6 = vpop.permute.xlu1 %23  }
  0x7d   :  { %14 = vst.msk [vmem:[#allocation0] sm:$0x1] %vm13_vm1, %v12_v5  }
  0x80   :  { %v18_v7 = vpop.permute.xlu0 %17  }
  0x81   :  { %20 = vst.msk [vmem:[#allocation0] sm:$0x1] %vm19_vm2, %v18_v7  }
  0x82   :  { %26 = vst.msk [vmem:[#allocation0] sm:$0x1] %vm25_vm3, %v24_v6  }
  0x89   :  { %v30_v8 = vld [vmem:[#allocation0] sm:$0x1] }
  0x8a   :  { %32 = vst [vmem:[%s56_s1] sm:$0x1] %v30_v8 }

// kernel: tile.28
= control target key start
LH: loop header
LB: loop body
LE: loop exit
PB: predicated region body
PF: predicated region fallthrough
CT: control target
= control target key end

     0   :  { %s22_s0 = inlined_call_operand.vmem [shape: f32[4], index: 0, kind: input, shape index: {}]   ;;  %s23_s1 = inlined_call_operand.vmem [shape: f32[4,4], index: 1, kind: output, shape index: {}]  }
   0x1   :  { %v4_v0 = vld [vmem:[%s22_s0] ss:$0 sm:$0xff] }
   0x2   :  { %5 = vst [vmem:[%s23_s1] sm:$0xf] %v4_v0 }

// kernel: upsample_forward.3
= control target key start
LH: loop header
LB: loop body
LE: loop exit
PB: predicated region body
PF: predicated region fallthrough
CT: control target
= control target key end

     0   :  { %s564_s12 = smov 0   ;;  %s711_s0 = inlined_call_operand.vmem [shape: bf16[512,128], index: 0, kind: input, shape index: {}]   ;;  %s712_s1 = inlined_call_operand.vmem [shape: f32[1,128], index: 1, kind: input, shape index: {}]   ;;  %s713_s2 = inlined_call_operand.vmem [shape: f32[1,128], index: 2, kind: input, shape index: {}]   ;;  %s714_s3 = inlined_call_operand.vmem [shape: f32[512,128], index: 3, kind: output, shape index: {}]  }
   0x1 LB: > { %s436_s13 = sadd.s32 4294967295, %s542_s12   ;;  %p440_p0 = scmp.ge.s32.totalorder %s542_s12, 1  ;;  %s542_s12 = sphi %s564_s12, %s13_s12  }
   0x2   : > { %p138_p1 = scmp.lt.s32.totalorder %s542_s12, 3 }
   0x4   : > { %p139_p2 = pnand %p440_p0, %p138_p1 }
   0x5   : > { %s441_s14 = sshll.u32 (!%p139_p2), %s436_s13, 5  ;;  %v583_v0 = vld [vmem:[%s712_s1] ss:$0 sm:$0xff] (!%p139_p2) }
   0x6   : > { %142 = sbr.rel (%p139_p2) target bundleno = 53 (0x35), region = 32  ;;  %p163_p3 = scmp.lt.s32.totalorder (!%p139_p2), %s441_s14, 63  ;;  %v592_v9 = vld [vmem:[%s713_s2] ss:$0 sm:$0xff] (!%p139_p2) }
   0xd   : > { %s716_s14 = smov (!%p163_p3, %s441_s14), 63 }
   0xe   : > { %s442_s15 = sshll.u32 %s716_s14, 2  ;;  %s444_s23 = sshll.u32 %s716_s14, 3 }
   0xf   : > { %s578_s18 = scalar_lea.vmem %s711_s0, %s442_s15  ;;  %s610_s26 = scalar_lea.vmem %s714_s3, %s444_s23 }
  0x10   : > { %v450_v1 = vld [vmem:[%s578_s18] sm:$0xff]   ;;  %v513_v2 = vld [vmem:[%s578_s18 + $0x8] sm:$0xff]   ;;  %v514_v3 = vld [vmem:[%s578_s18 + $0x10] sm:$0xff]  }
  0x11   : > { %v451_v4 = vunpack.c.l.bf16 %v450_v1  ;;  %v452_v5 = vunpack.c.h.bf16 %v450_v1  ;;  %v455_v6 = vunpack.c.l.bf16 %v513_v2  ;;  %v456_v7 = vunpack.c.h.bf16 %v513_v2  ;;  %v515_v8 = vld [vmem:[%s578_s18 + $0x18] sm:$0xff]   ;;  %v516_v30 = vld [vmem:[%s578_s18 + $0x20] sm:$0xff]   ;;  %v517_v31 = vld [vmem:[%s578_s18 + $0x28] sm:$0xff]  }
  0x12   : > { %v459_v10 = vunpack.c.l.bf16 %v514_v3  ;;  %v460_v11 = vunpack.c.h.bf16 %v514_v3  ;;  %v463_v12 = vunpack.c.l.bf16 %v515_v8  ;;  %v464_v13 = vunpack.c.h.bf16 %v515_v8  ;;  %v518_v36 = vld [vmem:[%s578_s18 + $0x30] sm:$0xff]   ;;  %v519_v37 = vld [vmem:[%s578_s18 + $0x38] sm:$0xff]   ;;  %v520_v3 = vld [vmem:[%s578_s18 + $0x40] sm:$0xff]  }
  0x13   : > { %v245_v14 = vmul.f32 %v451_v4, %v583_v0  ;;  %v246_v15 = vmul.f32 %v452_v5, %v583_v0  ;;  %v247_v16 = vmul.f32 %v455_v6, %v583_v0  ;;  %v248_v17 = vmul.f32 %v456_v7, %v583_v0  ;;  %v521_v4 = vld [vmem:[%s578_s18 + $0x48] sm:$0xff]  }
  0x14   : > { %v249_v18 = vmul.f32 %v459_v10, %v583_v0  ;;  %v250_v19 = vmul.f32 %v460_v11, %v583_v0  ;;  %v251_v20 = vmul.f32 %v463_v12, %v583_v0  ;;  %v252_v21 = vmul.f32 %v464_v13, %v583_v0  ;;  %v522_v10 = vld [vmem:[%s578_s18 + $0x50] sm:$0xff]   ;;  %v523_v11 = vld [vmem:[%s578_s18 + $0x58] sm:$0xff]  }
  0x15   : > { %v284_v22 = vadd.f32 %v592_v9, %v245_v14  ;;  %v285_v23 = vadd.f32 %v592_v9, %v246_v15  ;;  %v286_v24 = vadd.f32 %v592_v9, %v247_v16  ;;  %v287_v25 = vadd.f32 %v592_v9, %v248_v17 }
  0x16   : > { %v288_v26 = vadd.f32 %v592_v9, %v249_v18  ;;  %v289_v27 = vadd.f32 %v592_v9, %v250_v19  ;;  %v290_v28 = vadd.f32 %v592_v9, %v251_v20  ;;  %v291_v29 = vadd.f32 %v592_v9, %v252_v21 }
  0x17   : > { %v316_v32 = vmax.f32 %v284_v22, 0.0  ;;  %v317_v33 = vmax.f32 %v285_v23, 0.0  ;;  %v318_v34 = vmax.f32 %v286_v24, 0.0  ;;  %v319_v35 = vmax.f32 %v287_v25, 0.0 }
  0x18   : > { %v320_v38 = vmax.f32 %v288_v26, 0.0  ;;  %v321_v39 = vmax.f32 %v289_v27, 0.0  ;;  %v322_v40 = vmax.f32 %v290_v28, 0.0  ;;  %v323_v41 = vmax.f32 %v291_v29, 0.0 }
  0x19   : > { %348 = vst [vmem:[%s610_s26] sm:$0xff] %v316_v32  ;;  %349 = vst [vmem:[%s610_s26 + $0x8] sm:$0xff] %v317_v33  ;;  %v467_v42 = vunpack.c.l.bf16 %v516_v30  ;;  %v468_v43 = vunpack.c.h.bf16 %v516_v30  ;;  %v471_v44 = vunpack.c.l.bf16 %v517_v31  ;;  %v472_v45 = vunpack.c.h.bf16 %v517_v31 }
  0x1a   : > { %350 = vst [vmem:[%s610_s26 + $0x10] sm:$0xff] %v318_v34  ;;  %351 = vst [vmem:[%s610_s26 + $0x18] sm:$0xff] %v319_v35  ;;  %v475_v46 = vunpack.c.l.bf16 %v518_v36  ;;  %v476_v47 = vunpack.c.h.bf16 %v518_v36  ;;  %v479_v48 = vunpack.c.l.bf16 %v519_v37  ;;  %v480_v49 = vunpack.c.h.bf16 %v519_v37 }
  0x1b   : > { %352 = vst [vmem:[%s610_s26 + $0x20] sm:$0xff] %v320_v38  ;;  %353 = vst [vmem:[%s610_s26 + $0x28] sm:$0xff] %v321_v39  ;;  %v253_v50 = vmul.f32 %v467_v42, %v583_v0  ;;  %v254_v51 = vmul.f32 %v468_v43, %v583_v0  ;;  %v255_v52 = vmul.f32 %v471_v44, %v583_v0  ;;  %v483_v16 = vunpack.c.l.bf16 %v520_v3 }
  0x1c   : > { %354 = vst [vmem:[%s610_s26 + $0x30] sm:$0xff] %v322_v40  ;;  %355 = vst [vmem:[%s610_s26 + $0x38] sm:$0xff] %v323_v41  ;;  %v256_v53 = vmul.f32 %v472_v45, %v583_v0  ;;  %v257_v54 = vmul.f32 %v475_v46, %v583_v0  ;;  %v258_v55 = vmul.f32 %v476_v47, %v583_v0  ;;  %v484_v17 = vunpack.c.h.bf16 %v520_v3  ;;  %v524_v40 = vld [vmem:[%s578_s18 + $0x60] sm:$0xff]   ;;  %v525_v41 = vld [vmem:[%s578_s18 + $0x68] sm:$0xff]  }
  0x1d   : > { %v259_v56 = vmul.f32 %v479_v48, %v583_v0  ;;  %v260_v57 = vmul.f32 %v480_v49, %v583_v0  ;;  %v292_v58 = vadd.f32 %v592_v9, %v253_v50  ;;  %v293_v59 = vadd.f32 %v592_v9, %v254_v51  ;;  %v526_v46 = vld [vmem:[%s578_s18 + $0x70] sm:$0xff]   ;;  %v527_v47 = vld [vmem:[%s578_s18 + $0x78] sm:$0xff]  }
  0x1e   : > { %v294_v60 = vadd.f32 %v592_v9, %v255_v52  ;;  %v295_v61 = vadd.f32 %v592_v9, %v256_v53  ;;  %v296_v62 = vadd.f32 %v592_v9, %v257_v54  ;;  %v297_v63 = vadd.f32 %v592_v9, %v258_v55 }
  0x1f   : > { %v298_v1 = vadd.f32 %v592_v9, %v259_v56  ;;  %v299_v2 = vadd.f32 %v592_v9, %v260_v57  ;;  %v324_v5 = vmax.f32 %v292_v58, 0.0  ;;  %v325_v6 = vmax.f32 %v293_v59, 0.0 }
  0x20   : > { %v326_v7 = vmax.f32 %v294_v60, 0.0  ;;  %v327_v8 = vmax.f32 %v295_v61, 0.0  ;;  %v328_v12 = vmax.f32 %v296_v62, 0.0  ;;  %v329_v13 = vmax.f32 %v297_v63, 0.0 }
  0x21   : > { %v330_v14 = vmax.f32 %v298_v1, 0.0  ;;  %v331_v15 = vmax.f32 %v299_v2, 0.0  ;;  %356 = vst [vmem:[%s610_s26 + $0x40] sm:$0xff] %v324_v5  ;;  %357 = vst [vmem:[%s610_s26 + $0x48] sm:$0xff] %v325_v6  ;;  %v487_v18 = vunpack.c.l.bf16 %v521_v4  ;;  %v488_v19 = vunpack.c.h.bf16 %v521_v4 }
  0x22   : > { %358 = vst [vmem:[%s610_s26 + $0x50] sm:$0xff] %v326_v7  ;;  %359 = vst [vmem:[%s610_s26 + $0x58] sm:$0xff] %v327_v8  ;;  %v491_v20 = vunpack.c.l.bf16 %v522_v10  ;;  %v492_v21 = vunpack.c.h.bf16 %v522_v10  ;;  %v495_v22 = vunpack.c.l.bf16 %v523_v11  ;;  %v496_v23 = vunpack.c.h.bf16 %v523_v11 }
  0x23   : > { %360 = vst [vmem:[%s610_s26 + $0x60] sm:$0xff] %v328_v12  ;;  %361 = vst [vmem:[%s610_s26 + $0x68] sm:$0xff] %v329_v13  ;;  %v261_v24 = vmul.f32 %v483_v16, %v583_v0  ;;  %v262_v25 = vmul.f32 %v484_v17, %v583_v0  ;;  %v263_v26 = vmul.f32 %v487_v18, %v583_v0  ;;  %v499_v52 = vunpack.c.l.bf16 %v524_v40 }
  0x24   : > { %362 = vst [vmem:[%s610_s26 + $0x70] sm:$0xff] %v330_v14  ;;  %363 = vst [vmem:[%s610_s26 + $0x78] sm:$0xff] %v331_v15  ;;  %v264_v27 = vmul.f32 %v488_v19, %v583_v0  ;;  %v265_v28 = vmul.f32 %v491_v20, %v583_v0  ;;  %v266_v29 = vmul.f32 %v492_v21, %v583_v0  ;;  %v500_v53 = vunpack.c.h.bf16 %v524_v40 }
  0x25   : > { %v267_v30 = vmul.f32 %v495_v22, %v583_v0  ;;  %v268_v31 = vmul.f32 %v496_v23, %v583_v0  ;;  %v300_v32 = vadd.f32 %v592_v9, %v261_v24  ;;  %v301_v33 = vadd.f32 %v592_v9, %v262_v25 }
  0x26   : > { %v302_v34 = vadd.f32 %v592_v9, %v263_v26  ;;  %v303_v35 = vadd.f32 %v592_v9, %v264_v27  ;;  %v304_v36 = vadd.f32 %v592_v9, %v265_v28  ;;  %v305_v37 = vadd.f32 %v592_v9, %v266_v29 }
  0x27   : > { %v306_v38 = vadd.f32 %v592_v9, %v267_v30  ;;  %v307_v39 = vadd.f32 %v592_v9, %v268_v31  ;;  %v332_v42 = vmax.f32 %v300_v32, 0.0  ;;  %v333_v43 = vmax.f32 %v301_v33, 0.0 }
  0x28   : > { %v334_v44 = vmax.f32 %v302_v34, 0.0  ;;  %v335_v45 = vmax.f32 %v303_v35, 0.0  ;;  %v336_v48 = vmax.f32 %v304_v36, 0.0  ;;  %v337_v49 = vmax.f32 %v305_v37, 0.0 }
  0x29   : > { %v338_v50 = vmax.f32 %v306_v38, 0.0  ;;  %v339_v51 = vmax.f32 %v307_v39, 0.0  ;;  %364 = vst [vmem:[%s610_s26 + $0x80] sm:$0xff] %v332_v42  ;;  %365 = vst [vmem:[%s610_s26 + $0x88] sm:$0xff] %v333_v43  ;;  %v503_v54 = vunpack.c.l.bf16 %v525_v41  ;;  %v504_v55 = vunpack.c.h.bf16 %v525_v41 }
  0x2a   : > { %366 = vst [vmem:[%s610_s26 + $0x90] sm:$0xff] %v334_v44  ;;  %367 = vst [vmem:[%s610_s26 + $0x98] sm:$0xff] %v335_v45  ;;  %v507_v56 = vunpack.c.l.bf16 %v526_v46  ;;  %v508_v57 = vunpack.c.h.bf16 %v526_v46  ;;  %v511_v58 = vunpack.c.l.bf16 %v527_v47  ;;  %v512_v59 = vunpack.c.h.bf16 %v527_v47 }
  0x2b   : > { %368 = vst [vmem:[%s610_s26 + $0xa0] sm:$0xff] %v336_v48  ;;  %369 = vst [vmem:[%s610_s26 + $0xa8] sm:$0xff] %v337_v49  ;;  %v269_v60 = vmul.f32 %v499_v52, %v583_v0  ;;  %v270_v61 = vmul.f32 %v500_v53, %v583_v0  ;;  %v271_v62 = vmul.f32 %v503_v54, %v583_v0 }
  0x2c   : > { %370 = vst [vmem:[%s610_s26 + $0xb0] sm:$0xff] %v338_v50  ;;  %371 = vst [vmem:[%s610_s26 + $0xb8] sm:$0xff] %v339_v51  ;;  %v272_v63 = vmul.f32 %v504_v55, %v583_v0  ;;  %v273_v1 = vmul.f32 %v507_v56, %v583_v0  ;;  %v274_v2 = vmul.f32 %v508_v57, %v583_v0 }
  0x2d   : > { %v275_v3 = vmul.f32 %v511_v58, %v583_v0  ;;  %v276_v4 = vmul.f32 %v512_v59, %v583_v0  ;;  %v308_v5 = vadd.f32 %v592_v9, %v269_v60  ;;  %v309_v6 = vadd.f32 %v592_v9, %v270_v61 }
  0x2e   : > { %v310_v7 = vadd.f32 %v592_v9, %v271_v62  ;;  %v311_v8 = vadd.f32 %v592_v9, %v272_v63  ;;  %v312_v10 = vadd.f32 %v592_v9, %v273_v1  ;;  %v313_v11 = vadd.f32 %v592_v9, %v274_v2 }
  0x2f   : > { %v314_v0 = vadd.f32 %v592_v9, %v275_v3  ;;  %v315_v12 = vadd.f32 %v592_v9, %v276_v4  ;;  %v340_v13 = vmax.f32 %v308_v5, 0.0  ;;  %v341_v14 = vmax.f32 %v309_v6, 0.0 }
  0x30   : > { %v342_v15 = vmax.f32 %v310_v7, 0.0  ;;  %v343_v16 = vmax.f32 %v311_v8, 0.0  ;;  %v344_v17 = vmax.f32 %v312_v10, 0.0  ;;  %v345_v18 = vmax.f32 %v313_v11, 0.0 }
  0x31   : > { %v346_v19 = vmax.f32 %v314_v0, 0.0  ;;  %v347_v20 = vmax.f32 %v315_v12, 0.0  ;;  %372 = vst [vmem:[%s610_s26 + $0xc0] sm:$0xff] %v340_v13  ;;  %373 = vst [vmem:[%s610_s26 + $0xc8] sm:$0xff] %v341_v14 }
  0x32   : > { %374 = vst [vmem:[%s610_s26 + $0xd0] sm:$0xff] %v342_v15  ;;  %375 = vst [vmem:[%s610_s26 + $0xd8] sm:$0xff] %v343_v16 }
  0x33   : > { %376 = vst [vmem:[%s610_s26 + $0xe0] sm:$0xff] %v344_v17  ;;  %377 = vst [vmem:[%s610_s26 + $0xe8] sm:$0xff] %v345_v18 }
  0x34   : > { %378 = vst [vmem:[%s610_s26 + $0xf0] sm:$0xff] %v346_v19  ;;  %379 = vst [vmem:[%s610_s26 + $0xf8] sm:$0xff] %v347_v20 }
  0x35 PF: > { %s13_s12 = sadd.s32 1, %s542_s12  }
  0x36   : > { %p10_p4 = scmp.ge.s32.totalorder %s13_s12, 4  }
  0x38   :  { %12 = sbr.rel (!%p10_p4) target bundleno = 1 (0x1), region = 62 }

// kernel: upsample_forward.2
= control target key start
LH: loop header
LB: loop body
LE: loop exit
PB: predicated region body
PF: predicated region fallthrough
CT: control target
= control target key end

     0   :  { %s1529_s18 = smov 0   ;;  %s1531_s19 = smov 0   ;;  %s1732_s0 = inlined_call_operand.vmem [shape: bf16[512,8], index: 0, kind: input, shape index: {}]   ;;  %s1733_s1 = inlined_call_operand.vmem [shape: bf16[8,128], index: 1, kind: input, shape index: {}]   ;;  %s1734_s2 = inlined_call_operand.vmem [shape: f32[1,128], index: 2, kind: input, shape index: {}]   ;;  %s1735_s3 = inlined_call_operand.vmem [shape: bf16[512,128], index: 3, kind: output, shape index: {0}]   ;;  %s1736_s4 = inlined_call_operand.vmem [shape: f32[16,128], index: 4, kind: output, shape index: {1}]   ;;  %s1737_s5 = inlined_call_operand.vmem [shape: f32[16,128], index: 5, kind: output, shape index: {2}]  }
   0x1   :  { %s1533_s20 = smov 0  }
   0x2 LB: > { %s35_s21 = sadd.s32 1, %s1493_s19  ;;  %p1179_p0 = scmp.ge.s32.totalorder %s1497_s20, 1  ;;  %s1497_s20 = sphi %s1533_s20, %s16_s20   ;;  %s1493_s19 = sphi %s1531_s19, %s1739_s19   ;;  %s1489_s18 = sphi %s1529_s18, %s1738_s18  }
   0x3   : > { %p37_p1 = scmp.ge.s32.totalorder %s35_s21, 2  ;;  %p245_p2 = scmp.lt.s32.totalorder %s1497_s20, 3 }
   0x5   : > { %s1741_s21 = smov (%p37_p1, %s35_s21), 0  ;;  %p246_p3 = pnand %p1179_p0, %p245_p2 }
   0x6   : > { %v379_v0 = vld [vmem:[%s1733_s1] sm:$0xf] (!%p246_p3)  ;;  %vm509_vm0 = vcmask (!%p246_p3), 1043456   ;;  %s1180_s24 = sshll.u32 (!%p246_p3), %s1489_s18, 5  ;;  %vm460_vm1 = vcmask (!%p246_p3), 64512   ;;  %p331_p5 = scmp.lt.s32.totalorder (!%p246_p3), %s1489_s18, 1 }
   0x7   : > { %249 = sbr.rel (%p246_p3) target bundleno = 313 (0x139), region = 32  ;;  %1433 = vmatprep.subr.msk.bf16.mxu0 (!%p246_p3), %vm509_vm0, %v379_v0  ;;  %v511_v1 = vsel (!%p246_p3), %vm509_vm0, %v379_v0, 0  ;;  %p304_p4 = scmp.lt.s32.totalorder (!%p246_p3), %s1180_s24, 63  ;;  %1434 = vmatprep.subr.msk.bf16.mxu1 (!%p246_p3), %vm509_vm0, %v379_v0  ;;  %v1598_v18 = vld [vmem:[%s1734_s2] ss:$0 sm:$0xff] (!%p246_p3) }
   0x8   : > { %1398 = vmatpush3.bf16.msra.mxu0 (!%p246_p3), %v511_v1  ;;  %1432 = vmatpush3.bf16.msra.mxu1 (!%p246_p3), %v511_v1 }
   0xe   : > { %s1743_s24 = smov (!%p304_p4, %s1180_s24), 63  ;;  %s1745_s18 = smov (!%p331_p5, %s1489_s18), 1 }
   0xf   : > { %s1181_s25 = sshll.u32 %s1743_s24, 2  ;;  %s1184_s9 = sshll.u32 %s1745_s18, 3 }
  0x10   : > { %s1561_s28 = scalar_lea.vmem %s1732_s0, %s1181_s25  ;;  %s1608_s8 = scalar_lea.vmem %s1735_s3, %s1181_s25 }
  0x11   : > { %v1459_v2 = vld [vmem:[%s1561_s28] sm:$0xff]   ;;  %v1460_v3 = vld [vmem:[%s1561_s28 + $0x8] sm:$0xff]   ;;  %v1461_v4 = vld [vmem:[%s1561_s28 + $0x10] sm:$0xff]   ;;  %s337_s12 = scalar_lea.vmem %s1736_s4, %s1184_s9  ;;  %s344_s15 = scalar_lea.vmem %s1737_s5, %s1184_s9 }
  0x12   : > { %1399 = vmatprep.mubr.msk.bf16.mxu0 %vm460_vm1, %v1459_v2  ;;  %v1462_v5 = vld [vmem:[%s1561_s28 + $0x18] sm:$0xff]   ;;  %v1463_v6 = vld [vmem:[%s1561_s28 + $0x20] sm:$0xff]   ;;  %v1468_v8 = vld [vmem:[%s1561_s28 + $0x48] sm:$0xff]  }
  0x13   : > { %1400 = vmatmul.mubr.msk.bf16.vlgmr.msra.gmra.mrb[0].mxu0 %vm460_vm1, %v1460_v3  ;;  %v1467_v7 = vld [vmem:[%s1561_s28 + $0x40] sm:$0xff]   ;;  %v1469_v9 = vld [vmem:[%s1561_s28 + $0x50] sm:$0xff]   ;;  %v1464_v10 = vld [vmem:[%s1561_s28 + $0x28] sm:$0xff]  }
  0x14   : > { %1403 = vmatprep.mubr.msk.bf16.mxu0 %vm460_vm1, %v1461_v4  ;;  %1415 = vmatprep.mubr.msk.bf16.mxu1 %vm460_vm1, %v1467_v7  ;;  %v1470_v11 = vld [vmem:[%s1561_s28 + $0x58] sm:$0xff]   ;;  %v1465_v12 = vld [vmem:[%s1561_s28 + $0x30] sm:$0xff]   ;;  %v1471_v13 = vld [vmem:[%s1561_s28 + $0x60] sm:$0xff]  }
  0x15   : > { %1416 = vmatmul.mubr.msk.bf16.vlgmr.msra.gmra.mrb[0].mxu1 %vm460_vm1, %v1468_v8  ;;  %v1466_v14 = vld [vmem:[%s1561_s28 + $0x38] sm:$0xff]   ;;  %v1472_v15 = vld [vmem:[%s1561_s28 + $0x68] sm:$0xff]   ;;  %v1473_v16 = vld [vmem:[%s1561_s28 + $0x70] sm:$0xff]  }
  0x16   : > { %1419 = vmatprep.mubr.msk.bf16.mxu1 %vm460_vm1, %v1469_v9  ;;  %v1474_v17 = vld [vmem:[%s1561_s28 + $0x78] sm:$0xff]  }
  0x1b   : > { %1404 = vmatmul.mubr.msk.bf16.gmra.mrb[4].mxu0 %vm460_vm1, %v1462_v5 }
  0x1c   : > { %1407 = vmatprep.mubr.msk.bf16.mxu0 %vm460_vm1, %v1463_v6 }
  0x1d   : > { %1420 = vmatmul.mubr.msk.bf16.gmra.mrb[4].mxu1 %vm460_vm1, %v1470_v11 }
  0x1e   : > { %1423 = vmatprep.mubr.msk.bf16.mxu1 %vm460_vm1, %v1471_v13 }
  0x23   : > { %1408 = vmatmul.mubr.msk.bf16.gmra.mrb[8].mxu0 %vm460_vm1, %v1464_v10 }
  0x24   : > { %1411 = vmatprep.mubr.msk.bf16.mxu0 %vm460_vm1, %v1465_v12 }
  0x25   : > { %1424 = vmatmul.mubr.msk.bf16.gmra.mrb[8].mxu1 %vm460_vm1, %v1472_v15 }
  0x26   : > { %1427 = vmatprep.mubr.msk.bf16.mxu1 %vm460_vm1, %v1473_v16 }
  0x2b   : > { %1412 = vmatmul.mubr.msk.bf16.gmra.mrb[12].mxu0 %vm460_vm1, %v1466_v14 }
  0x2d   : > { %1428 = vmatmul.mubr.msk.bf16.gmra.mrb[12].mxu1 %vm460_vm1, %v1474_v17 }
  0xe6   : > { %v1401_v19 = vpop.f32.mrb[0].mxu0 }
  0xe7   : > { %v547_v20 = vpop.f32.mrb[1].mxu0  ;;  %v682_v23 = vadd.f32 %v1401_v19, %v1598_v18 }
  0xe8   : > { %v680_v21 = vadd.f32 %v1598_v18, %v547_v20  ;;  %v1402_v22 = vpop.f32.mrb[2].mxu0  ;;  %v1417_v36 = vpop.f32.mrb[0].mxu1 }
  0xe9   : > { %v683_v24 = vadd.f32 %v1402_v22, %v1598_v18  ;;  %v550_v25 = vpop.f32.mrb[3].mxu0  ;;  %v911_v32 = vmul.f32 %v682_v23, %v682_v23  ;;  %v1614_v38 = vadd.f32 %v1417_v36, %v1598_v18  ;;  %v611_v39 = vpop.f32.mrb[1].mxu1 }
  0xea   : > { %v681_v26 = vadd.f32 %v1598_v18, %v550_v25  ;;  %v909_v28 = vmul.f32 %v680_v21, %v680_v21  ;;  %v1418_v45 = vpop.f32.mrb[2].mxu1  ;;  %v1624_v56 = vadd.f32 %v1598_v18, %v611_v39 }
  0xeb   : > { %v1293_v27 = vpack.c.bf16 %v683_v24, %v682_v23  ;;  %v912_v40 = vmul.f32 %v683_v24, %v683_v24  ;;  %v1620_v49 = vadd.f32 %v1418_v45, %v1598_v18  ;;  %v614_v50 = vpop.f32.mrb[3].mxu1 }
  0xec   : > { %v1288_v29 = vpack.c.bf16 %v681_v26, %v680_v21  ;;  %v872_v30 = vadd.f32 %v681_v26, %v680_v21  ;;  %v910_v31 = vmul.f32 %v681_v26, %v681_v26  ;;  %v1631_v62 = vadd.f32 %v1598_v18, %v614_v50 }
  0xed   : > { %1365 = vst [vmem:[%s1608_s8 + $0x8] sm:$0xff] %v1293_v27   ;;  %v1333_v57 = vpack.c.bf16 %v1620_v49, %v1614_v38 }
  0xee   : > { %1289 = vst [vmem:[%s1608_s8] sm:$0xff] %v1288_v29   ;;  %v873_v33 = vadd.f32 %v872_v30, %v682_v23  ;;  %v941_v34 = vadd.f32 %v910_v31, %v909_v28  ;;  %v1405_v35 = vpop.f32.mrb[4].mxu0  ;;  %v1328_v5 = vpack.c.bf16 %v1631_v62, %v1624_v56 }
  0xef   : > { %v563_v37 = vpop.f32.mrb[5].mxu0  ;;  %v686_v46 = vadd.f32 %v1405_v35, %v1598_v18  ;;  %1373 = vst [vmem:[%s1608_s8 + $0x48] sm:$0xff] %v1333_v57  }
  0xf0   : > { %v942_v41 = vadd.f32 %v941_v34, %v911_v32  ;;  %v684_v42 = vadd.f32 %v1598_v18, %v563_v37  ;;  %v874_v43 = vadd.f32 %v873_v33, %v683_v24  ;;  %v1406_v44 = vpop.f32.mrb[6].mxu0  ;;  %v1421_v3 = vpop.f32.mrb[4].mxu1  ;;  %1372 = vst [vmem:[%s1608_s8 + $0x40] sm:$0xff] %v1328_v5  }
  0xf1   : > { %v687_v47 = vadd.f32 %v1406_v44, %v1598_v18  ;;  %v566_v48 = vpop.f32.mrb[7].mxu0  ;;  %v915_v63 = vmul.f32 %v686_v46, %v686_v46  ;;  %v1637_v6 = vadd.f32 %v1421_v3, %v1598_v18  ;;  %v627_v7 = vpop.f32.mrb[5].mxu1 }
  0xf2   : > { %v875_v51 = vadd.f32 %v874_v43, %v684_v42  ;;  %v913_v52 = vmul.f32 %v684_v42, %v684_v42  ;;  %v943_v53 = vadd.f32 %v942_v41, %v912_v40  ;;  %v685_v54 = vadd.f32 %v1598_v18, %v566_v48  ;;  %v1422_v13 = vpop.f32.mrb[6].mxu1 }
  0xf3   : > { %v1303_v55 = vpack.c.bf16 %v687_v47, %v686_v46  ;;  %v916_v8 = vmul.f32 %v687_v47, %v687_v47  ;;  %v1644_v17 = vadd.f32 %v1422_v13, %v1598_v18  ;;  %v630_v19 = vpop.f32.mrb[7].mxu1  ;;  %v1648_v25 = vadd.f32 %v1598_v18, %v627_v7 }
  0xf4   : > { %v944_v58 = vadd.f32 %v943_v53, %v913_v52  ;;  %v1298_v59 = vpack.c.bf16 %v685_v54, %v684_v42  ;;  %v876_v60 = vadd.f32 %v875_v51, %v685_v54  ;;  %v914_v61 = vmul.f32 %v685_v54, %v685_v54 }
  0xf5   : > { %1367 = vst [vmem:[%s1608_s8 + $0x18] sm:$0xff] %v1303_v55   ;;  %v1343_v26 = vpack.c.bf16 %v1644_v17, %v1637_v6  ;;  %v1655_v31 = vadd.f32 %v1598_v18, %v630_v19 }
  0xf6   : > { %1366 = vst [vmem:[%s1608_s8 + $0x10] sm:$0xff] %v1298_v59   ;;  %v877_v0 = vadd.f32 %v876_v60, %v686_v46  ;;  %v945_v1 = vadd.f32 %v944_v58, %v914_v61  ;;  %v1409_v2 = vpop.f32.mrb[8].mxu0 }
  0xf7   : > { %v579_v4 = vpop.f32.mrb[9].mxu0  ;;  %v690_v14 = vadd.f32 %v1409_v2, %v1598_v18  ;;  %1375 = vst [vmem:[%s1608_s8 + $0x58] sm:$0xff] %v1343_v26   ;;  %v1338_v39 = vpack.c.bf16 %v1655_v31, %v1648_v25 }
  0xf8   : > { %v946_v9 = vadd.f32 %v945_v1, %v915_v63  ;;  %v688_v10 = vadd.f32 %v1598_v18, %v579_v4  ;;  %v878_v11 = vadd.f32 %v877_v0, %v687_v47  ;;  %v1410_v12 = vpop.f32.mrb[10].mxu0  ;;  %v1425_v36 = vpop.f32.mrb[8].mxu1 }
  0xf9   : > { %v691_v15 = vadd.f32 %v1410_v12, %v1598_v18  ;;  %v582_v16 = vpop.f32.mrb[11].mxu0  ;;  %v919_v32 = vmul.f32 %v690_v14, %v690_v14  ;;  %v1661_v40 = vadd.f32 %v1425_v36, %v1598_v18  ;;  %v643_v41 = vpop.f32.mrb[9].mxu1  ;;  %1374 = vst [vmem:[%s1608_s8 + $0x50] sm:$0xff] %v1338_v39   ;;  %v929_v36 = vmul.f32 %v1648_v25, %v1648_v25 }
  0xfa   : > { %v879_v20 = vadd.f32 %v878_v11, %v688_v10  ;;  %v917_v21 = vmul.f32 %v688_v10, %v688_v10  ;;  %v947_v22 = vadd.f32 %v946_v9, %v916_v8  ;;  %v689_v23 = vadd.f32 %v1598_v18, %v582_v16  ;;  %v1426_v47 = vpop.f32.mrb[10].mxu1 }
  0xfb   : > { %v1313_v24 = vpack.c.bf16 %v691_v15, %v690_v14  ;;  %v920_v42 = vmul.f32 %v691_v15, %v691_v15  ;;  %v1668_v52 = vadd.f32 %v1426_v47, %v1598_v18  ;;  %v646_v53 = vpop.f32.mrb[11].mxu1  ;;  %v704_v60 = vadd.f32 %v1598_v18, %v643_v41 }
  0xfc   : > { %v948_v27 = vadd.f32 %v947_v22, %v917_v21  ;;  %v1308_v28 = vpack.c.bf16 %v689_v23, %v688_v10  ;;  %v880_v29 = vadd.f32 %v879_v20, %v689_v23  ;;  %v918_v30 = vmul.f32 %v689_v23, %v689_v23 }
  0xfd   : > { %1369 = vst [vmem:[%s1608_s8 + $0x28] sm:$0xff] %v1313_v24   ;;  %v1353_v61 = vpack.c.bf16 %v1668_v52, %v1661_v40  ;;  %v705_v3 = vadd.f32 %v1598_v18, %v646_v53  ;;  %v925_v9 = vmul.f32 %v1624_v56, %v1624_v56 }
  0xfe   : > { %1368 = vst [vmem:[%s1608_s8 + $0x20] sm:$0xff] %v1308_v28   ;;  %v881_v33 = vadd.f32 %v880_v29, %v690_v14  ;;  %v949_v34 = vadd.f32 %v948_v27, %v918_v30  ;;  %v1413_v35 = vpop.f32.mrb[12].mxu0  ;;  %v926_v29 = vmul.f32 %v1631_v62, %v1631_v62 }
  0xff   : > { %v595_v37 = vpop.f32.mrb[13].mxu0  ;;  %v694_v48 = vadd.f32 %v1413_v35, %v1598_v18  ;;  %1377 = vst [vmem:[%s1608_s8 + $0x68] sm:$0xff] %v1353_v61   ;;  %v1348_v10 = vpack.c.bf16 %v705_v3, %v704_v60  ;;  %v934_v53 = vmul.f32 %v705_v3, %v705_v3 }
 0x100   : > { %v950_v43 = vadd.f32 %v949_v34, %v919_v32  ;;  %v692_v44 = vadd.f32 %v1598_v18, %v595_v37  ;;  %v882_v45 = vadd.f32 %v881_v33, %v691_v15  ;;  %v1414_v46 = vpop.f32.mrb[14].mxu0  ;;  %v1429_v8 = vpop.f32.mrb[12].mxu1  ;;  %v927_v32 = vmul.f32 %v1614_v38, %v1614_v38 }
 0x101   : > { %v695_v50 = vadd.f32 %v1414_v46, %v1598_v18  ;;  %v598_v51 = vpop.f32.mrb[15].mxu0  ;;  %v923_v4 = vmul.f32 %v694_v48, %v694_v48  ;;  %v710_v11 = vadd.f32 %v1429_v8, %v1598_v18  ;;  %v659_v12 = vpop.f32.mrb[13].mxu1  ;;  %1376 = vst [vmem:[%s1608_s8 + $0x60] sm:$0xff] %v1348_v10  }
 0x102   : > { %v883_v54 = vadd.f32 %v882_v45, %v692_v44  ;;  %v921_v55 = vmul.f32 %v692_v44, %v692_v44  ;;  %v951_v57 = vadd.f32 %v950_v43, %v920_v42  ;;  %v693_v58 = vadd.f32 %v1598_v18, %v598_v51  ;;  %v1430_v19 = vpop.f32.mrb[14].mxu1 }
 0x103   : > { %v1323_v59 = vpack.c.bf16 %v695_v50, %v694_v48  ;;  %v924_v13 = vmul.f32 %v695_v50, %v695_v50  ;;  %v708_v16 = vadd.f32 %v1598_v18, %v659_v12  ;;  %v711_v20 = vadd.f32 %v1430_v19, %v1598_v18  ;;  %v662_v21 = vpop.f32.mrb[15].mxu1 }
 0x104   : > { %v952_v63 = vadd.f32 %v951_v57, %v921_v55  ;;  %v1318_v0 = vpack.c.bf16 %v693_v58, %v692_v44  ;;  %v884_v1 = vadd.f32 %v883_v54, %v693_v58  ;;  %v922_v2 = vmul.f32 %v693_v58, %v693_v58 }
 0x105   : > { %1371 = vst [vmem:[%s1608_s8 + $0x38] sm:$0xff] %v1323_v59   ;;  %v709_v24 = vadd.f32 %v1598_v18, %v662_v21  ;;  %v1363_v26 = vpack.c.bf16 %v711_v20, %v710_v11  ;;  %v931_v42 = vmul.f32 %v1637_v6, %v1637_v6  ;;  %v936_v55 = vmul.f32 %v1668_v52, %v1668_v52 }
 0x106   : > { %1370 = vst [vmem:[%s1608_s8 + $0x30] sm:$0xff] %v1318_v0   ;;  %v885_v5 = vadd.f32 %v884_v1, %v694_v48  ;;  %v953_v7 = vadd.f32 %v952_v63, %v922_v2  ;;  %v939_v1 = vmul.f32 %v710_v11, %v710_v11 }
 0x107   : > { %v1358_v30 = vpack.c.bf16 %v709_v24, %v708_v16  ;;  %1379 = vst [vmem:[%s1608_s8 + $0x78] sm:$0xff] %v1363_v26   ;;  %v938_v0 = vmul.f32 %v709_v24, %v709_v24 }
 0x108   : > { %v954_v14 = vadd.f32 %v953_v7, %v923_v4  ;;  %v886_v15 = vadd.f32 %v885_v5, %v695_v50  ;;  %v940_v4 = vmul.f32 %v711_v20, %v711_v20 }
 0x109   : > { %1378 = vst [vmem:[%s1608_s8 + $0x70] sm:$0xff] %v1358_v30  }
 0x10a   : > { %v887_v22 = vadd.f32 %v886_v15, %v1624_v56  ;;  %v955_v23 = vadd.f32 %v954_v14, %v924_v13  ;;  %v928_v56 = vmul.f32 %v1620_v49, %v1620_v49 }
 0x10c   : > { %v956_v27 = vadd.f32 %v955_v23, %v925_v9  ;;  %v888_v28 = vadd.f32 %v887_v22, %v1631_v62 }
 0x10e   : > { %v889_v33 = vadd.f32 %v888_v28, %v1614_v38  ;;  %v957_v34 = vadd.f32 %v956_v27, %v926_v29  ;;  %v930_v38 = vmul.f32 %v1655_v31, %v1655_v31 }
 0x110   : > { %v958_v18 = vadd.f32 %v957_v34, %v927_v32  ;;  %v890_v35 = vadd.f32 %v889_v33, %v1620_v49  ;;  %v932_v49 = vmul.f32 %v1644_v17, %v1644_v17 }
 0x112   : > { %v891_v62 = vadd.f32 %v890_v35, %v1648_v25  ;;  %v959_v37 = vadd.f32 %v958_v18, %v928_v56  ;;  %v933_v25 = vmul.f32 %v704_v60, %v704_v60 }
 0x114   : > { %v960_v39 = vadd.f32 %v959_v37, %v929_v36  ;;  %v892_v41 = vadd.f32 %v891_v62, %v1655_v31  ;;  %v935_v31 = vmul.f32 %v1661_v40, %v1661_v40 }
 0x116   : > { %v893_v43 = vadd.f32 %v892_v41, %v1637_v6  ;;  %v961_v44 = vadd.f32 %v960_v39, %v930_v38 }
 0x118   : > { %v962_v45 = vadd.f32 %v961_v44, %v931_v42  ;;  %v894_v46 = vadd.f32 %v893_v43, %v1644_v17  ;;  %v937_v17 = vmul.f32 %v708_v16, %v708_v16 }
 0x11a   : > { %v895_v47 = vadd.f32 %v894_v46, %v704_v60  ;;  %v963_v48 = vadd.f32 %v962_v45, %v932_v49 }
 0x11c   : > { %v964_v50 = vadd.f32 %v963_v48, %v933_v25  ;;  %v896_v51 = vadd.f32 %v895_v47, %v705_v3 }
 0x11e   : > { %v897_v54 = vadd.f32 %v896_v51, %v1661_v40  ;;  %v965_v6 = vadd.f32 %v964_v50, %v934_v53 }
 0x120   : > { %v966_v57 = vadd.f32 %v965_v6, %v935_v31  ;;  %v898_v58 = vadd.f32 %v897_v54, %v1668_v52 }
 0x122   : > { %v899_v59 = vadd.f32 %v898_v58, %v708_v16  ;;  %v967_v60 = vadd.f32 %v966_v57, %v936_v55 }
 0x124   : > { %v968_v61 = vadd.f32 %v967_v60, %v937_v17  ;;  %v900_v63 = vadd.f32 %v899_v59, %v709_v24 }
 0x126   : > { %v901_v2 = vadd.f32 %v900_v63, %v710_v11  ;;  %v969_v3 = vadd.f32 %v968_v61, %v938_v0 }
 0x128   : > { %v902_v40 = vadd.f32 %v901_v2, %v711_v20  ;;  %v970_v5 = vadd.f32 %v969_v3, %v939_v1 }
 0x12a   : > { %v903_v7 = vrot.slane %v902_v40, 4  ;;  %v971_v8 = vadd.f32 %v970_v5, %v940_v4 }
 0x12c   : > { %v904_v9 = vadd.f32 %v903_v7, %v902_v40  ;;  %v972_v10 = vrot.slane %v971_v8, 4 }
 0x12e   : > { %v905_v52 = vrot.slane %v904_v9, 2  ;;  %v973_v12 = vadd.f32 %v972_v10, %v971_v8 }
 0x130   : > { %v906_v13 = vadd.f32 %v905_v52, %v904_v9  ;;  %v974_v14 = vrot.slane %v973_v12, 2 }
 0x132   : > { %v907_v15 = vrot.slane %v906_v13, 1  ;;  %v975_v16 = vadd.f32 %v974_v14, %v973_v12 }
 0x134   : > { %v908_v11 = vadd.f32 %v907_v15, %v906_v13  ;;  %v976_v19 = vrot.slane %v975_v16, 1 }
 0x136   : > { %v977_v20 = vadd.f32 %v976_v19, %v975_v16  ;;  %978 = vst [vmem:[%s337_s12] sm:$0xff] %v908_v11 }
 0x138   : > { %979 = vst [vmem:[%s344_s15] sm:$0xff] %v977_v20 }
 0x139 PF: > { %s16_s20 = sadd.s32 1, %s1497_s20   ;;  %s1738_s18 = smov %s1493_s19 }
 0x13a   : > { %p13_p6 = scmp.ge.s32.totalorder %s16_s20, 4   ;;  %s1739_s19 = smov %s1741_s21 }
 0x13c   :  { %15 = sbr.rel (!%p13_p6) target bundleno = 2 (0x2), region = 92 }

</bundles_post_ra>
